<compile_context>
chip_gen: v6e
topology: v6e:2x2x1
jax: 0.10.0
libtpu: 0.0.40
codegen_flags: <defaults>
</compile_context>

<pallas_src>
import jax
import jax.numpy as jnp
from jax.experimental import pallas as pl
from jax.experimental.pallas import tpu as pltpu


def relu_conv1x1_kernel(x_ref, w_ref, o_ref):
    # x_ref: (Cin, HW) f32, w_ref: (Cout, Cin) f32, o_ref: (Cout, HW) f32.
    # bf16 cast first, ReLU in bf16 (identical to relu-then-cast), then the MXU
    # runs its native bf16 path with f32 accumulation.
    x = jnp.maximum(x_ref[...].astype(jnp.bfloat16), 0)
    w = w_ref[...].astype(jnp.bfloat16)  # in-kernel VPU cast; no wrapper convert op
    o_ref[...] = jnp.dot(
        w, x, preferred_element_type=jnp.float32
    ).astype(o_ref.dtype)


def relu_conv1x1(x_nchw, weight):
    """x_nchw: (1, Cin, H, W) float32, weight: (Cout, Cin, 1, 1) float32.

    Equivalent to ReLU followed by Conv2d(Cin, Cout, kernel_size=1, bias=False).
    NOTE: this transpose-free path assumes batch size 1 (what the module uses);
    batched inputs would need a different (transposing) wrapper.
    """
    N, Cin, H, W = x_nchw.shape
    Cout = weight.shape[0]
    assert N == 1, "this transpose-free path assumes batch size 1"
    HW = H * W

    # Pure views — no transposes, no casts, no extra XLA ops in the wrapper.
    x2d = x_nchw.reshape(Cin, HW)
    w2d = weight.reshape(Cout, Cin)

    itemsize = jnp.dtype(x_nchw.dtype).itemsize
    cost = pl.CostEstimate(
        flops=2 * Cout * Cin * HW,
        bytes_accessed=(Cin * HW + Cout * Cin + Cout * HW) * itemsize,
        transcendentals=0,
    )

    out2d = pl.pallas_call(
        relu_conv1x1_kernel,
        out_shape=jax.ShapeDtypeStruct((Cout, HW), x_nchw.dtype),
        in_specs=[
            pl.BlockSpec(memory_space=pltpu.MemorySpace.VMEM),
            pl.BlockSpec(memory_space=pltpu.MemorySpace.VMEM),
        ],
        out_specs=pl.BlockSpec(memory_space=pltpu.MemorySpace.VMEM),
        cost_estimate=cost,
    )(x2d, w2d)

    # (Cout, HW) -> (1, Cout, H, W): pure view.
    return out2d.reshape(1, Cout, H, W)


if __name__ == "__main__":
    key = jax.random.PRNGKey(0)
    kx, kw = jax.random.split(key)

    # Shapes from the module: input (1, 864, 7, 7), conv 864 -> 144, 1x1, no bias.
    x = jax.random.normal(kx, (1, 864, 7, 7), dtype=jnp.float32)
    weight = jax.random.normal(kw, (144, 864, 1, 1), dtype=jnp.float32) * 0.02

    fn = jax.jit(relu_conv1x1)
    out = jax.block_until_ready(fn(x, weight))
    assert out.shape == (1, 144, 7, 7)

    # Tight check: reference with the same bf16-rounded operands and f32
    # accumulation — verifies the kernel math itself.
    x_relu = jnp.maximum(x, 0.0)
    xb = x_relu.astype(jnp.bfloat16).astype(jnp.float32)
    wb = weight.reshape(144, 864).astype(jnp.bfloat16).astype(jnp.float32)
    ref_bf16 = jnp.einsum(
        "nchw,oc->nohw", xb, wb, precision=jax.lax.Precision.HIGHEST
    )
    assert jnp.allclose(out, ref_bf16, atol=1e-3, rtol=1e-3)

    # Loose check vs the full-precision f32 reference (bf16 operand quantization
    # over K=864 stays well inside this band).
    ref_f32 = jnp.einsum(
        "nchw,oc->nohw", x_relu, weight.reshape(144, 864),
        precision=jax.lax.Precision.HIGHEST,
    )
    assert jnp.allclose(out, ref_f32, atol=3e-2, rtol=3e-2)

    print("KERNEL_OK")
</pallas_src>

<mosaic_0001>
module attributes {stable_mosaic.version = 11 : i64} {
  func.func @relu_conv1x1_kernel(%arg0: memref<864x49xf32, #tpu.memory_space<vmem>>, %arg1: memref<144x864xf32, #tpu.memory_space<vmem>>, %arg2: memref<144x49xf32, #tpu.memory_space<vmem>>) attributes {dimension_semantics = [], scalar_prefetch = 0 : i64, scratch_operands = 0 : i64, tpu.core_type = #tpu.core_type<tc>} {
    %c0 = arith.constant 0 : index
    %c0_0 = arith.constant 0 : index
    %0 = vector.load %arg0[%c0, %c0_0] : memref<864x49xf32, #tpu.memory_space<vmem>>, vector<864x49xf32>
    %1 = arith.truncf %0 : vector<864x49xf32> to vector<864x49xbf16>
    %cst = arith.constant 0.000000e+00 : bf16
    %2 = vector.broadcast %cst : bf16 to vector<864x49xbf16>
    %3 = arith.maximumf %1, %2 : vector<864x49xbf16>
    %c0_1 = arith.constant 0 : index
    %c0_2 = arith.constant 0 : index
    %4 = vector.load %arg1[%c0_1, %c0_2] : memref<144x864xf32, #tpu.memory_space<vmem>>, vector<144x864xf32>
    %5 = arith.truncf %4 : vector<144x864xf32> to vector<144x864xbf16>
    %cst_3 = arith.constant dense<0.000000e+00> : vector<144x49xf32>
    %6 = tpu.matmul %5, %3, %cst_3 {dimension_numbers = #tpu.dot_dimension_numbers<[1], [0], [0], [1], [0, 0, 1, 1], [], []>} : vector<144x864xbf16>, vector<864x49xbf16>, vector<144x49xf32> -> vector<144x49xf32>
    %c0_4 = arith.constant 0 : index
    %c0_5 = arith.constant 0 : index
    %7 = vector.load %arg2[%c0_4, %c0_5] : memref<144x49xf32, #tpu.memory_space<vmem>>, vector<144x49xf32>
    tpu.vector_store %arg2[%c0_4, %c0_5], %6 {strides = array<i32>} : memref<144x49xf32, #tpu.memory_space<vmem>>, vector<144x49xf32>,
    return
  }
}

</mosaic_0001>

<bundles_post_ra>
// kernel: relu_conv1x1.1
= control target key start
LH: loop header
LB: loop body
LE: loop exit
PB: predicated region body
PF: predicated region fallthrough
CT: control target
= control target key end

     0   :  { %v1173_v12 = vmov 0   ;;  %vm1175_vm0 = vmmov 0   ;;  %vm417_vm1 = vcmask 785408   ;;  %vm865_vm2 = vcmask 400384   ;;  %s2106_s0 = inlined_call_operand.vmem [shape: f32[864,49], index: 0, kind: input, shape index: {}]   ;;  %s2107_s1 = inlined_call_operand.vmem [shape: f32[144,864], index: 1, kind: input, shape index: {}]   ;;  %s2108_s2 = inlined_call_operand.vmem [shape: f32[144,49], index: 2, kind: output, shape index: {}]  }
   0x1   :  { %v42_v0 = vld [vmem:[%s2106_s0 + $0xf0] sm:$0xff]  ;;  %v43_v1 = vld [vmem:[%s2106_s0 + $0xf8] sm:$0xff]  ;;  %v40_v11 = vld [vmem:[%s2106_s0 + $0xe0] sm:$0xff] }
   0x2   :  { %v74_v2 = vld [vmem:[%s2106_s0 + $0x1f0] sm:$0xff]  ;;  %v135_v3 = vpack.c.bf16 %v43_v1, %v42_v0  ;;  %v75_v4 = vld [vmem:[%s2106_s0 + $0x1f8] sm:$0xff]  ;;  %v41_v15 = vld [vmem:[%s2106_s0 + $0xe8] sm:$0xff] }
   0x3   :  { %v26_v5 = vld [vmem:[%s2106_s0 + $0x70] sm:$0xff]  ;;  %v27_v6 = vld [vmem:[%s2106_s0 + $0x78] sm:$0xff]  ;;  %v151_v7 = vpack.c.bf16 %v75_v4, %v74_v2  ;;  %v72_v16 = vld [vmem:[%s2106_s0 + $0x1e0] sm:$0xff]  ;;  %v134_v20 = vpack.c.bf16 %v41_v15, %v40_v11 }
   0x4   :  { %v127_v8 = vpack.c.bf16 %v27_v6, %v26_v5  ;;  %v58_v9 = vld [vmem:[%s2106_s0 + $0x170] sm:$0xff]  ;;  %v59_v10 = vld [vmem:[%s2106_s0 + $0x178] sm:$0xff]  ;;  %v189_v13 = vmax.bf16 %v1173_v12, %v135_v3  ;;  %v73_v17 = vld [vmem:[%s2106_s0 + $0x1e8] sm:$0xff] }
   0x5   :  { %v143_v14 = vpack.c.bf16 %v59_v10, %v58_v9  ;;  %v205_v18 = vmax.bf16 %v1173_v12, %v151_v7  ;;  %v150_v21 = vpack.c.bf16 %v73_v17, %v72_v16  ;;  %v24_v22 = vld [vmem:[%s2106_s0 + $0x60] sm:$0xff]  ;;  %v25_v23 = vld [vmem:[%s2106_s0 + $0x68] sm:$0xff]  ;;  %v38_v28 = vld [vmem:[%s2106_s0 + $0xd0] sm:$0xff]  ;;  %v188_v30 = vmax.bf16 %v1173_v12, %v134_v20 }
   0x6   :  { %v181_v19 = vmax.bf16 %v1173_v12, %v127_v8  ;;  %v56_v24 = vld [vmem:[%s2106_s0 + $0x160] sm:$0xff]  ;;  %897 = vmatprep.subr.bf16.mxu0 %v189_v13  ;;  %v126_v26 = vpack.c.bf16 %v25_v23, %v24_v22  ;;  %v57_v27 = vld [vmem:[%s2106_s0 + $0x168] sm:$0xff]  ;;  %v39_v29 = vld [vmem:[%s2106_s0 + $0xd8] sm:$0xff] }
   0x7   :  { %v197_v25 = vmax.bf16 %v1173_v12, %v143_v14  ;;  %967 = vmatprep.subr.bf16.mxu1 %v205_v18  ;;  %v204_v31 = vmax.bf16 %v1173_v12, %v150_v21  ;;  %v142_v32 = vpack.c.bf16 %v57_v27, %v56_v24  ;;  %v70_v33 = vld [vmem:[%s2106_s0 + $0x1d0] sm:$0xff]  ;;  %v71_v34 = vld [vmem:[%s2106_s0 + $0x1d8] sm:$0xff]  ;;  %v133_v37 = vpack.c.bf16 %v39_v29, %v38_v28  ;;  %v36_v45 = vld [vmem:[%s2106_s0 + $0xc0] sm:$0xff] }
   0x8   :  { %898 = vmatpush3.bf16.msra.mxu0 %v181_v19  ;;  %v22_v35 = vld [vmem:[%s2106_s0 + $0x50] sm:$0xff]  ;;  %v180_v36 = vmax.bf16 %v1173_v12, %v126_v26  ;;  %v149_v38 = vpack.c.bf16 %v71_v34, %v70_v33  ;;  %v23_v39 = vld [vmem:[%s2106_s0 + $0x58] sm:$0xff]  ;;  %v37_v46 = vld [vmem:[%s2106_s0 + $0xc8] sm:$0xff] }
   0x9   :  { %968 = vmatpush3.bf16.msra.mxu1 %v197_v25  ;;  %v54_v40 = vld [vmem:[%s2106_s0 + $0x150] sm:$0xff]  ;;  %v55_v41 = vld [vmem:[%s2106_s0 + $0x158] sm:$0xff]  ;;  %899 = vmatprep.subr.bf16.mxu0 %v188_v30  ;;  %v196_v42 = vmax.bf16 %v1173_v12, %v142_v32  ;;  %v125_v43 = vpack.c.bf16 %v23_v39, %v22_v35  ;;  %v68_v47 = vld [vmem:[%s2106_s0 + $0x1c0] sm:$0xff]  ;;  %v187_v48 = vmax.bf16 %v1173_v12, %v133_v37 }
   0xa   :  { %969 = vmatprep.subr.bf16.mxu1 %v204_v31  ;;  %v141_v44 = vpack.c.bf16 %v55_v41, %v54_v40  ;;  %v203_v49 = vmax.bf16 %v1173_v12, %v149_v38  ;;  %v132_v50 = vpack.c.bf16 %v37_v46, %v36_v45  ;;  %v69_v51 = vld [vmem:[%s2106_s0 + $0x1c8] sm:$0xff]  ;;  %v20_v52 = vld [vmem:[%s2106_s0 + $0x40] sm:$0xff]  ;;  %v34_v59 = vld [vmem:[%s2106_s0 + $0xb0] sm:$0xff] }
   0xb   :  { %v21_v53 = vld [vmem:[%s2106_s0 + $0x48] sm:$0xff]  ;;  %v179_v54 = vmax.bf16 %v1173_v12, %v125_v43  ;;  %v148_v55 = vpack.c.bf16 %v69_v51, %v68_v47  ;;  %v52_v57 = vld [vmem:[%s2106_s0 + $0x140] sm:$0xff]  ;;  %v35_v63 = vld [vmem:[%s2106_s0 + $0xb8] sm:$0xff] }
   0xc   :  { %900 = vmatpush3.bf16.msra.mxu0 %v180_v36  ;;  %v124_v56 = vpack.c.bf16 %v21_v53, %v20_v52  ;;  %v53_v58 = vld [vmem:[%s2106_s0 + $0x148] sm:$0xff]  ;;  %v195_v60 = vmax.bf16 %v1173_v12, %v141_v44  ;;  %v186_v61 = vmax.bf16 %v1173_v12, %v132_v50  ;;  %v66_v0 = vld [vmem:[%s2106_s0 + $0x1b0] sm:$0xff]  ;;  %v67_v1 = vld [vmem:[%s2106_s0 + $0x1b8] sm:$0xff]  ;;  %v131_v3 = vpack.c.bf16 %v35_v63, %v34_v59 }
   0xd   :  { %970 = vmatpush3.bf16.msra.mxu1 %v196_v42  ;;  %901 = vmatprep.subr.bf16.mxu0 %v187_v48  ;;  %v140_v62 = vpack.c.bf16 %v53_v58, %v52_v57  ;;  %v202_v2 = vmax.bf16 %v1173_v12, %v148_v55  ;;  %v147_v4 = vpack.c.bf16 %v67_v1, %v66_v0  ;;  %v18_v5 = vld [vmem:[%s2106_s0 + $0x30] sm:$0xff]  ;;  %v19_v6 = vld [vmem:[%s2106_s0 + $0x38] sm:$0xff]  ;;  %v32_v9 = vld [vmem:[%s2106_s0 + $0xa0] sm:$0xff] }
   0xe   :  { %971 = vmatprep.subr.bf16.mxu1 %v203_v49  ;;  %v50_v7 = vld [vmem:[%s2106_s0 + $0x130] sm:$0xff]  ;;  %v51_v8 = vld [vmem:[%s2106_s0 + $0x138] sm:$0xff]  ;;  %v33_v10 = vld [vmem:[%s2106_s0 + $0xa8] sm:$0xff]  ;;  %v178_v11 = vmax.bf16 %v1173_v12, %v124_v56  ;;  %v123_v14 = vpack.c.bf16 %v19_v6, %v18_v5  ;;  %v185_v18 = vmax.bf16 %v1173_v12, %v131_v3 }
   0xf   :  { %v194_v13 = vmax.bf16 %v1173_v12, %v140_v62  ;;  %v64_v15 = vld [vmem:[%s2106_s0 + $0x1a0] sm:$0xff]  ;;  %v65_v16 = vld [vmem:[%s2106_s0 + $0x1a8] sm:$0xff]  ;;  %v139_v19 = vpack.c.bf16 %v51_v8, %v50_v7  ;;  %v130_v20 = vpack.c.bf16 %v33_v10, %v32_v9  ;;  %v201_v24 = vmax.bf16 %v1173_v12, %v147_v4  ;;  %v30_v26 = vld [vmem:[%s2106_s0 + $0x90] sm:$0xff] }
  0x10   :  { %902 = vmatpush3.bf16.msra.mxu0 %v179_v54  ;;  %v16_v17 = vld [vmem:[%s2106_s0 + $0x20] sm:$0xff]  ;;  %v17_v21 = vld [vmem:[%s2106_s0 + $0x28] sm:$0xff]  ;;  %v146_v25 = vpack.c.bf16 %v65_v16, %v64_v15  ;;  %v31_v27 = vld [vmem:[%s2106_s0 + $0x98] sm:$0xff]  ;;  %v177_v31 = vmax.bf16 %v1173_v12, %v123_v14 }
  0x11   :  { %972 = vmatpush3.bf16.msra.mxu1 %v195_v60  ;;  %903 = vmatprep.subr.bf16.mxu0 %v186_v61  ;;  %v48_v22 = vld [vmem:[%s2106_s0 + $0x120] sm:$0xff]  ;;  %v49_v23 = vld [vmem:[%s2106_s0 + $0x128] sm:$0xff]  ;;  %v122_v28 = vpack.c.bf16 %v17_v21, %v16_v17  ;;  %v62_v29 = vld [vmem:[%s2106_s0 + $0x190] sm:$0xff]  ;;  %v193_v34 = vmax.bf16 %v1173_v12, %v139_v19  ;;  %v184_v35 = vmax.bf16 %v1173_v12, %v130_v20 }
  0x12   :  { %973 = vmatprep.subr.bf16.mxu1 %v202_v2  ;;  %v63_v30 = vld [vmem:[%s2106_s0 + $0x198] sm:$0xff]  ;;  %v138_v32 = vpack.c.bf16 %v49_v23, %v48_v22  ;;  %v14_v33 = vld [vmem:[%s2106_s0 + $0x10] sm:$0xff]  ;;  %v129_v36 = vpack.c.bf16 %v31_v27, %v30_v26  ;;  %v200_v40 = vmax.bf16 %v1173_v12, %v146_v25  ;;  %v28_v42 = vld [vmem:[%s2106_s0 + $0x80] sm:$0xff] }
  0x13   :  { %v15_v37 = vld [vmem:[%s2106_s0 + $0x18] sm:$0xff]  ;;  %v46_v38 = vld [vmem:[%s2106_s0 + $0x110] sm:$0xff]  ;;  %v145_v41 = vpack.c.bf16 %v63_v30, %v62_v29  ;;  %v29_v43 = vld [vmem:[%s2106_s0 + $0x88] sm:$0xff]  ;;  %v176_v45 = vmax.bf16 %v1173_v12, %v122_v28 }
  0x14   :  { %904 = vmatpush3.bf16.msra.mxu0 %v178_v11  ;;  %v47_v39 = vld [vmem:[%s2106_s0 + $0x118] sm:$0xff]  ;;  %v60_v44 = vld [vmem:[%s2106_s0 + $0x180] sm:$0xff]  ;;  %v61_v46 = vld [vmem:[%s2106_s0 + $0x188] sm:$0xff]  ;;  %v192_v49 = vmax.bf16 %v1173_v12, %v138_v32  ;;  %v121_v50 = vpack.c.bf16 %v15_v37, %v14_v33  ;;  %v183_v55 = vmax.bf16 %v1173_v12, %v129_v36  ;;  %v128_v56 = vpack.c.bf16 %v29_v43, %v28_v42 }
  0x15   :  { %974 = vmatpush3.bf16.msra.mxu1 %v194_v13  ;;  %905 = vmatprep.subr.bf16.mxu0 %v185_v18  ;;  %v229_v47 = vld [vmem:[%s2107_s1 + $0x8] sm:$0xff]  ;;  %v236_v48 = vld [vmem:[%s2107_s1 + $0x40] sm:$0xff]  ;;  %v137_v51 = vpack.c.bf16 %v47_v39, %v46_v38  ;;  %v231_v53 = vld [vmem:[%s2107_s1 + $0x18] sm:$0xff]  ;;  %v199_v61 = vmax.bf16 %v1173_v12, %v145_v41  ;;  %v144_v62 = vpack.c.bf16 %v61_v46, %v60_v44  ;;  %v1174_v43 = vmov 0.0  }
  0x16   :  { %975 = vmatprep.subr.bf16.mxu1 %v201_v24  ;;  %v355_v52 = vpack.c.bf16 %v236_v48, %v229_v47  ;;  %v238_v54 = vld [vmem:[%s2107_s1 + $0x50] sm:$0xff]  ;;  %v12_v57 = vld [vmem:[%s2106_s0] sm:$0xff]  ;;  %v13_v58 = vld [vmem:[%s2106_s0 + $0x8] sm:$0xff]  ;;  %v175_v2 = vmax.bf16 %v1173_v12, %v121_v50  ;;  %v182_v5 = vmax.bf16 %v1173_v12, %v128_v56 }
  0x17   :  { %v44_v59 = vld [vmem:[%s2106_s0 + $0x100] sm:$0xff]  ;;  %v357_v60 = vpack.c.bf16 %v238_v54, %v231_v53  ;;  %v45_v63 = vld [vmem:[%s2106_s0 + $0x108] sm:$0xff]  ;;  %v106_v0 = vld [vmem:[%s2106_s0 + $0x2f0] sm:$0xff]  ;;  %v191_v3 = vmax.bf16 %v1173_v12, %v137_v51  ;;  %v120_v4 = vpack.c.bf16 %v13_v58, %v12_v57  ;;  %v198_v10 = vmax.bf16 %v1173_v12, %v144_v62 }
  0x18   :  { %906 = vmatpush3.bf16.msra.mxu0 %v177_v31  ;;  %477 = vmatprep.mubr.bf16.mxu0 %v355_v52  ;;  %v107_v1 = vld [vmem:[%s2106_s0 + $0x2f8] sm:$0xff]  ;;  %v136_v6 = vpack.c.bf16 %v45_v63, %v44_v59  ;;  %v90_v8 = vld [vmem:[%s2106_s0 + $0x270] sm:$0xff]  ;;  %v228_v11 = vld [vmem:[%s2107_s1] sm:$0xff] }
  0x19   :  { %976 = vmatpush3.bf16.msra.mxu1 %v193_v34  ;;  %907 = vmatprep.subr.bf16.mxu0 %v184_v35  ;;  %v167_v7 = vpack.c.bf16 %v107_v1, %v106_v0  ;;  %v91_v9 = vld [vmem:[%s2106_s0 + $0x278] sm:$0xff]  ;;  %v118_v14 = vld [vmem:[%s2106_s0 + $0x350] sm:$0xff]  ;;  %v104_v16 = vld [vmem:[%s2106_s0 + $0x2e0] sm:$0xff]  ;;  %v174_v18 = vmax.bf16 %v1173_v12, %v120_v4 }
  0x1a   :  { %977 = vmatprep.subr.bf16.mxu1 %v200_v40  ;;  %582 = vmatprep.mubr.bf16.mxu1 %v357_v60  ;;  %v235_v13 = vld [vmem:[%s2107_s1 + $0x38] sm:$0xff]  ;;  %v105_v17 = vld [vmem:[%s2106_s0 + $0x2e8] sm:$0xff]  ;;  %v230_v19 = vld [vmem:[%s2107_s1 + $0x10] sm:$0xff]  ;;  %v159_v21 = vpack.c.bf16 %v91_v9, %v90_v8  ;;  %v190_v23 = vmax.bf16 %v1173_v12, %v136_v6 }
  0x1b   :  { %v119_v15 = vld [vmem:[%s2106_s0 + $0x358] sm:$0xff]  ;;  %v237_v20 = vld [vmem:[%s2107_s1 + $0x48] sm:$0xff]  ;;  %v221_v24 = vmax.bf16 %v1173_v12, %v167_v7  ;;  %v250_v25 = vld [vmem:[%s2107_s1 + $0xb0] sm:$0xff]  ;;  %v166_v31 = vpack.c.bf16 %v105_v17, %v104_v16  ;;  %v354_v33 = vpack.c.bf16 %v235_v13, %v228_v11 }
  0x1c   :  { %908 = vmatpush3.bf16.msra.mxu0 %v176_v45  ;;  %v243_v22 = vld [vmem:[%s2107_s1 + $0x78] sm:$0xff]  ;;  %v88_v26 = vld [vmem:[%s2106_s0 + $0x260] sm:$0xff]  ;;  %v89_v27 = vld [vmem:[%s2106_s0 + $0x268] sm:$0xff]  ;;  %v173_v30 = vpack.c.bf16 %v119_v15, %v118_v14  ;;  %v356_v35 = vpack.c.bf16 %v237_v20, %v230_v19  ;;  %v213_v36 = vmax.bf16 %v1173_v12, %v159_v21 }
  0x1d   :  { %978 = vmatpush3.bf16.msra.mxu1 %v192_v49  ;;  %909 = vmatprep.subr.bf16.mxu0 %v183_v55  ;;  %v245_v28 = vld [vmem:[%s2107_s1 + $0x88] sm:$0xff]  ;;  %v252_v29 = vld [vmem:[%s2107_s1 + $0xc0] sm:$0xff]  ;;  %v102_v32 = vld [vmem:[%s2106_s0 + $0x2d0] sm:$0xff]  ;;  %v158_v37 = vpack.c.bf16 %v89_v27, %v88_v26  ;;  %v362_v40 = vpack.c.bf16 %v250_v25, %v243_v22  ;;  %v220_v47 = vmax.bf16 %v1173_v12, %v166_v31 }
  0x1e   :  { %979 = vmatprep.subr.bf16.mxu1 %v199_v61  ;;  %v103_v34 = vld [vmem:[%s2106_s0 + $0x2d8] sm:$0xff]  ;;  %v116_v38 = vld [vmem:[%s2106_s0 + $0x340] sm:$0xff]  ;;  %v117_v39 = vld [vmem:[%s2106_s0 + $0x348] sm:$0xff]  ;;  %v364_v41 = vpack.c.bf16 %v252_v29, %v245_v28  ;;  %v227_v44 = vmax.bf16 %v1173_v12, %v173_v30 }
  0x1f   :  { %v165_v42 = vpack.c.bf16 %v103_v34, %v102_v32  ;;  %v242_v45 = vld [vmem:[%s2107_s1 + $0x70] sm:$0xff]  ;;  %v249_v46 = vld [vmem:[%s2107_s1 + $0xa8] sm:$0xff]  ;;  %v87_v49 = vld [vmem:[%s2106_s0 + $0x258] sm:$0xff]  ;;  %v172_v50 = vpack.c.bf16 %v117_v39, %v116_v38  ;;  %v212_v55 = vmax.bf16 %v1173_v12, %v158_v37 }
  0x20   :  { %910 = vmatpush3.bf16.msra.mxu0 %v175_v2  ;;  %v86_v48 = vld [vmem:[%s2106_s0 + $0x250] sm:$0xff]  ;;  %v244_v51 = vld [vmem:[%s2107_s1 + $0x80] sm:$0xff]  ;;  %v101_v53 = vld [vmem:[%s2106_s0 + $0x2c8] sm:$0xff]  ;;  %v361_v4 = vpack.c.bf16 %v249_v46, %v242_v45 }
  0x21   :  { %980 = vmatpush3.bf16.msra.mxu1 %v191_v3  ;;  %911 = vmatprep.subr.bf16.mxu0 %v182_v5  ;;  %v100_v52 = vld [vmem:[%s2106_s0 + $0x2c0] sm:$0xff]  ;;  %v251_v54 = vld [vmem:[%s2107_s1 + $0xb8] sm:$0xff]  ;;  %v257_v56 = vld [vmem:[%s2107_s1 + $0xe8] sm:$0xff]  ;;  %v219_v60 = vmax.bf16 %v1173_v12, %v165_v42  ;;  %v157_v61 = vpack.c.bf16 %v87_v49, %v86_v48  ;;  %v226_v63 = vmax.bf16 %v1173_v12, %v172_v50 }
  0x22   :  { %981 = vmatprep.subr.bf16.mxu1 %v198_v10  ;;  %v264_v57 = vld [vmem:[%s2107_s1 + $0x120] sm:$0xff]  ;;  %v259_v58 = vld [vmem:[%s2107_s1 + $0xf8] sm:$0xff]  ;;  %v266_v59 = vld [vmem:[%s2107_s1 + $0x130] sm:$0xff]  ;;  %v164_v0 = vpack.c.bf16 %v101_v53, %v100_v52  ;;  %v363_v6 = vpack.c.bf16 %v251_v54, %v244_v51 }
  0x23   :  { %v84_v62 = vld [vmem:[%s2106_s0 + $0x240] sm:$0xff]  ;;  %v85_v1 = vld [vmem:[%s2106_s0 + $0x248] sm:$0xff]  ;;  %v114_v2 = vld [vmem:[%s2106_s0 + $0x330] sm:$0xff]  ;;  %v369_v7 = vpack.c.bf16 %v264_v57, %v257_v56  ;;  %v371_v10 = vpack.c.bf16 %v266_v59, %v259_v58  ;;  %v211_v11 = vmax.bf16 %v1173_v12, %v157_v61 }
  0x24   :  { %912 = vmatpush3.bf16.msra.mxu0 %v174_v18  ;;  %v115_v3 = vld [vmem:[%s2106_s0 + $0x338] sm:$0xff]  ;;  %v98_v8 = vld [vmem:[%s2106_s0 + $0x2b0] sm:$0xff]  ;;  %v156_v13 = vpack.c.bf16 %v85_v1, %v84_v62  ;;  %v256_v14 = vld [vmem:[%s2107_s1 + $0xe0] sm:$0xff]  ;;  %v218_v16 = vmax.bf16 %v1173_v12, %v164_v0 }
  0x25   :  { %982 = vmatpush3.bf16.msra.mxu1 %v190_v23  ;;  %1037 = vmatprep.subr.bf16.mxu0 %v221_v24  ;;  %v171_v5 = vpack.c.bf16 %v115_v3, %v114_v2  ;;  %v99_v9 = vld [vmem:[%s2106_s0 + $0x2b8] sm:$0xff]  ;;  %v82_v19 = vld [vmem:[%s2106_s0 + $0x230] sm:$0xff]  ;;  %v265_v22 = vld [vmem:[%s2107_s1 + $0x128] sm:$0xff] }
  0x26   :  { %1122 = vmatprep.subr.bf16.mxu1 %v1174_v43  ;;  %v263_v15 = vld [vmem:[%s2107_s1 + $0x118] sm:$0xff]  ;;  %v163_v18 = vpack.c.bf16 %v99_v9, %v98_v8  ;;  %v258_v21 = vld [vmem:[%s2107_s1 + $0xf0] sm:$0xff]  ;;  %v112_v24 = vld [vmem:[%s2106_s0 + $0x320] sm:$0xff]  ;;  %v210_v29 = vmax.bf16 %v1173_v12, %v156_v13 }
  0x27   :  { %478 = vmatmul.mubr.bf16.vlgmr.msra.gmra.mxu0 %v354_v33  ;;  %v225_v17 = vmax.bf16 %v1173_v12, %v171_v5  ;;  %v83_v20 = vld [vmem:[%s2106_s0 + $0x238] sm:$0xff]  ;;  %v113_v25 = vld [vmem:[%s2106_s0 + $0x328] sm:$0xff]  ;;  %v96_v26 = vld [vmem:[%s2106_s0 + $0x2a0] sm:$0xff]  ;;  %v368_v38 = vpack.c.bf16 %v263_v15, %v256_v14 }
  0x28   :  { %583 = vmatmul.mubr.bf16.vlgmr.msra.gmra.mxu1 %v356_v35  ;;  %1038 = vmatpush3.bf16.msra.mxu0 %v213_v36  ;;  %v271_v23 = vld [vmem:[%s2107_s1 + $0x158] sm:$0xff]  ;;  %v278_v27 = vld [vmem:[%s2107_s1 + $0x190] sm:$0xff]  ;;  %v273_v28 = vld [vmem:[%s2107_s1 + $0x168] sm:$0xff]  ;;  %v155_v30 = vpack.c.bf16 %v83_v20, %v82_v19  ;;  %v170_v31 = vpack.c.bf16 %v113_v25, %v112_v24  ;;  %v217_v34 = vmax.bf16 %v1173_v12, %v163_v18 }
  0x29   :  { %485 = vmatprep.mubr.bf16.mxu0 %v362_v40  ;;  %590 = vmatprep.mubr.bf16.mxu1 %v364_v41  ;;  %v97_v32 = vld [vmem:[%s2106_s0 + $0x2a8] sm:$0xff]  ;;  %v280_v33 = vld [vmem:[%s2107_s1 + $0x1a0] sm:$0xff]  ;;  %v370_v40 = vpack.c.bf16 %v265_v22, %v258_v21  ;;  %v376_v41 = vpack.c.bf16 %v278_v27, %v271_v23  ;;  %v94_v42 = vld [vmem:[%s2106_s0 + $0x290] sm:$0xff] }
  0x2a   :  { %1123 = vmatpush3.bf16.msra.mxu1 %v227_v44  ;;  %1039 = vmatprep.subr.bf16.mxu0 %v220_v47  ;;  %v162_v35 = vpack.c.bf16 %v97_v32, %v96_v26  ;;  %v80_v36 = vld [vmem:[%s2106_s0 + $0x220] sm:$0xff]  ;;  %v81_v37 = vld [vmem:[%s2106_s0 + $0x228] sm:$0xff]  ;;  %v224_v39 = vmax.bf16 %v1173_v12, %v170_v31  ;;  %v378_v44 = vpack.c.bf16 %v280_v33, %v273_v28  ;;  %v95_v47 = vld [vmem:[%s2106_s0 + $0x298] sm:$0xff] }
  0x2b   :  { %1124 = vmatprep.subr.bf16.mxu1 %v1174_v43  ;;  %v209_v45 = vmax.bf16 %v1173_v12, %v155_v30  ;;  %v154_v46 = vpack.c.bf16 %v81_v37, %v80_v36  ;;  %v161_v49 = vpack.c.bf16 %v95_v47, %v94_v42  ;;  %v78_v50 = vld [vmem:[%s2106_s0 + $0x210] sm:$0xff]  ;;  %v79_v51 = vld [vmem:[%s2106_s0 + $0x218] sm:$0xff]  ;;  %v272_v56 = vld [vmem:[%s2107_s1 + $0x160] sm:$0xff] }
  0x2c   :  { %1040 = vmatpush3.bf16.msra.mxu0 %v212_v55  ;;  %v216_v48 = vmax.bf16 %v1173_v12, %v162_v35  ;;  %v110_v52 = vld [vmem:[%s2106_s0 + $0x310] sm:$0xff]  ;;  %v111_v53 = vld [vmem:[%s2106_s0 + $0x318] sm:$0xff]  ;;  %v277_v55 = vld [vmem:[%s2107_s1 + $0x188] sm:$0xff]  ;;  %v153_v62 = vpack.c.bf16 %v79_v51, %v78_v50 }
  0x2d   :  { %1041 = vmatprep.subr.bf16.mxu0 %v219_v60  ;;  %v270_v54 = vld [vmem:[%s2107_s1 + $0x150] sm:$0xff]  ;;  %v169_v57 = vpack.c.bf16 %v111_v53, %v110_v52  ;;  %v279_v58 = vld [vmem:[%s2107_s1 + $0x198] sm:$0xff]  ;;  %v285_v59 = vld [vmem:[%s2107_s1 + $0x1c8] sm:$0xff]  ;;  %v208_v61 = vmax.bf16 %v1173_v12, %v154_v46  ;;  %v215_v1 = vmax.bf16 %v1173_v12, %v161_v49 }
  0x2e   :  { %1125 = vmatpush3.bf16.msra.mxu1 %v226_v63  ;;  %v292_v60 = vld [vmem:[%s2107_s1 + $0x200] sm:$0xff]  ;;  %v287_v63 = vld [vmem:[%s2107_s1 + $0x1d8] sm:$0xff]  ;;  %v294_v0 = vld [vmem:[%s2107_s1 + $0x210] sm:$0xff] }
  0x2f   :  { %486 = vmatmul.mubr.bf16.gmra.mxu0 %v361_v4  ;;  %1126 = vmatprep.subr.bf16.mxu1 %v1174_v43  ;;  %v223_v2 = vmax.bf16 %v1173_v12, %v169_v57  ;;  %v92_v3 = vld [vmem:[%s2106_s0 + $0x280] sm:$0xff]  ;;  %v375_v4 = vpack.c.bf16 %v277_v55, %v270_v54  ;;  %v93_v5 = vld [vmem:[%s2106_s0 + $0x288] sm:$0xff]  ;;  %v291_v20 = vld [vmem:[%s2107_s1 + $0x1f8] sm:$0xff] }
  0x30   :  { %591 = vmatmul.mubr.bf16.gmra.mxu1 %v363_v6  ;;  %493 = vmatprep.mubr.bf16.mxu0 %v369_v7  ;;  %v377_v6 = vpack.c.bf16 %v279_v58, %v272_v56  ;;  %v383_v7 = vpack.c.bf16 %v292_v60, %v285_v59  ;;  %v160_v8 = vpack.c.bf16 %v93_v5, %v92_v3  ;;  %v76_v9 = vld [vmem:[%s2106_s0 + $0x200] sm:$0xff]  ;;  %v77_v13 = vld [vmem:[%s2106_s0 + $0x208] sm:$0xff]  ;;  %v286_v21 = vld [vmem:[%s2107_s1 + $0x1d0] sm:$0xff] }
  0x31   :  { %598 = vmatprep.mubr.bf16.mxu1 %v371_v10  ;;  %1042 = vmatpush3.bf16.msra.mxu0 %v211_v11  ;;  %v385_v10 = vpack.c.bf16 %v294_v0, %v287_v63  ;;  %v207_v11 = vmax.bf16 %v1173_v12, %v153_v62  ;;  %v108_v14 = vld [vmem:[%s2106_s0 + $0x300] sm:$0xff]  ;;  %v109_v15 = vld [vmem:[%s2106_s0 + $0x308] sm:$0xff]  ;;  %v299_v24 = vld [vmem:[%s2107_s1 + $0x238] sm:$0xff] }
  0x32   :  { %1043 = vmatprep.subr.bf16.mxu0 %v218_v16  ;;  %1127 = vmatpush3.bf16.msra.mxu1 %v225_v17  ;;  %v214_v16 = vmax.bf16 %v1173_v12, %v160_v8  ;;  %v152_v17 = vpack.c.bf16 %v77_v13, %v76_v9  ;;  %v168_v18 = vpack.c.bf16 %v109_v15, %v108_v14  ;;  %v284_v19 = vld [vmem:[%s2107_s1 + $0x1c0] sm:$0xff]  ;;  %v293_v23 = vld [vmem:[%s2107_s1 + $0x208] sm:$0xff]  ;;  %v306_v25 = vld [vmem:[%s2107_s1 + $0x270] sm:$0xff] }
  0x33   :  { %1128 = vmatprep.subr.bf16.mxu1 %v1174_v43  ;;  %v301_v27 = vld [vmem:[%s2107_s1 + $0x248] sm:$0xff]  ;;  %v308_v28 = vld [vmem:[%s2107_s1 + $0x280] sm:$0xff]  ;;  %v384_v30 = vpack.c.bf16 %v293_v23, %v286_v21  ;;  %v390_v31 = vpack.c.bf16 %v306_v25, %v299_v24  ;;  %v307_v35 = vld [vmem:[%s2107_s1 + $0x278] sm:$0xff] }
  0x34   :  { %v222_v22 = vmax.bf16 %v1173_v12, %v168_v18  ;;  %v206_v26 = vmax.bf16 %v1173_v12, %v152_v17  ;;  %v392_v32 = vpack.c.bf16 %v308_v28, %v301_v27  ;;  %v298_v12 = vld [vmem:[%s2107_s1 + $0x230] sm:$0xff]  ;;  %v305_v33 = vld [vmem:[%s2107_s1 + $0x268] sm:$0xff]  ;;  %v320_v37 = vld [vmem:[%s2107_s1 + $0x2e0] sm:$0xff] }
  0x35   :  { %1044 = vmatpush3.bf16.msra.mxu0 %v210_v29  ;;  %v382_v29 = vpack.c.bf16 %v291_v20, %v284_v19  ;;  %v313_v36 = vld [vmem:[%s2107_s1 + $0x2a8] sm:$0xff]  ;;  %v319_v46 = vld [vmem:[%s2107_s1 + $0x2d8] sm:$0xff]  ;;  %v314_v47 = vld [vmem:[%s2107_s1 + $0x2b0] sm:$0xff] }
  0x36   :  { %1045 = vmatprep.subr.bf16.mxu0 %v217_v34  ;;  %1129 = vmatpush3.bf16.msra.mxu1 %v224_v39  ;;  %v300_v34 = vld [vmem:[%s2107_s1 + $0x240] sm:$0xff]  ;;  %v322_v39 = vld [vmem:[%s2107_s1 + $0x2f0] sm:$0xff]  ;;  %v397_v42 = vpack.c.bf16 %v320_v37, %v313_v36  ;;  %v327_v49 = vld [vmem:[%s2107_s1 + $0x318] sm:$0xff] }
  0x37   :  { %494 = vmatmul.mubr.bf16.gmra.mxu0 %v368_v38  ;;  %1130 = vmatprep.subr.bf16.mxu1 %v1174_v43  ;;  %v315_v38 = vld [vmem:[%s2107_s1 + $0x2b8] sm:$0xff]  ;;  %v334_v50 = vld [vmem:[%s2107_s1 + $0x350] sm:$0xff]  ;;  %v329_v51 = vld [vmem:[%s2107_s1 + $0x328] sm:$0xff] }
  0x38   :  { %599 = vmatmul.mubr.bf16.gmra.mxu1 %v370_v40  ;;  %501 = vmatprep.mubr.bf16.mxu0 %v376_v41  ;;  %v389_v40 = vpack.c.bf16 %v305_v33, %v298_v12  ;;  %v391_v41 = vpack.c.bf16 %v307_v35, %v300_v34  ;;  %v336_v52 = vld [vmem:[%s2107_s1 + $0x360] sm:$0xff]  ;;  %v404_v55 = vpack.c.bf16 %v334_v50, %v327_v49  ;;  %v326_v57 = vld [vmem:[%s2107_s1 + $0x310] sm:$0xff]  ;;  %v333_v58 = vld [vmem:[%s2107_s1 + $0x348] sm:$0xff] }
  0x39   :  { %606 = vmatprep.mubr.bf16.mxu1 %v378_v44  ;;  %1046 = vmatpush3.bf16.msra.mxu0 %v209_v45  ;;  %v399_v44 = vpack.c.bf16 %v322_v39, %v315_v38  ;;  %v312_v45 = vld [vmem:[%s2107_s1 + $0x2a0] sm:$0xff]  ;;  %v406_v56 = vpack.c.bf16 %v336_v52, %v329_v51  ;;  %v335_v60 = vld [vmem:[%s2107_s1 + $0x358] sm:$0xff]  ;;  %v350_v0 = vld [vmem:[%s2107_s1 + $0x3d0] sm:$0xff] }
  0x3a   :  { %1047 = vmatprep.subr.bf16.mxu0 %v216_v48  ;;  %1131 = vmatpush3.bf16.msra.mxu1 %v223_v2  ;;  %v321_v48 = vld [vmem:[%s2107_s1 + $0x2e8] sm:$0xff]  ;;  %v396_v53 = vpack.c.bf16 %v319_v46, %v312_v45  ;;  %v328_v59 = vld [vmem:[%s2107_s1 + $0x320] sm:$0xff]  ;;  %v343_v63 = vld [vmem:[%s2107_s1 + $0x398] sm:$0xff] }
  0x3b   :  { %1132 = vmatprep.subr.bf16.mxu1 %v1174_v43  ;;  %v398_v54 = vpack.c.bf16 %v321_v48, %v314_v47  ;;  %v348_v62 = vld [vmem:[%s2107_s1 + $0x3c0] sm:$0xff]  ;;  %v405_v2 = vpack.c.bf16 %v335_v60, %v328_v59  ;;  %v349_v8 = vld [vmem:[%s2107_s1 + $0x3c8] sm:$0xff]  ;;  %v234_v17 = vld [vmem:[%s2107_s1 + $0x30] sm:$0xff] }
  0x3c   :  { %v340_v5 = vld [vmem:[%s2107_s1 + $0x380] sm:$0xff]  ;;  %v233_v9 = vld [vmem:[%s2107_s1 + $0x28] sm:$0xff]  ;;  %v247_v19 = vld [vmem:[%s2107_s1 + $0x98] sm:$0xff] }
  0x3d   :  { %1048 = vmatpush3.bf16.msra.mxu0 %v208_v61  ;;  %v341_v61 = vld [vmem:[%s2107_s1 + $0x388] sm:$0xff]  ;;  %v232_v15 = vld [vmem:[%s2107_s1 + $0x20] sm:$0xff]  ;;  %v254_v20 = vld [vmem:[%s2107_s1 + $0xd0] sm:$0xff] }
  0x3e   :  { %1049 = vmatprep.subr.bf16.mxu0 %v215_v1  ;;  %1133 = vmatpush3.bf16.msra.mxu1 %v222_v22  ;;  %v403_v1 = vpack.c.bf16 %v333_v58, %v326_v57  ;;  %v411_v3 = vpack.c.bf16 %v348_v62, %v341_v61  ;;  %v241_v18 = vld [vmem:[%s2107_s1 + $0x68] sm:$0xff]  ;;  %v366_v23 = vpack.c.bf16 %v254_v20, %v247_v19  ;;  %v246_v24 = vld [vmem:[%s2107_s1 + $0x90] sm:$0xff]  ;;  %v255_v27 = vld [vmem:[%s2107_s1 + $0xd8] sm:$0xff] }
  0x3f   :  { %502 = vmatmul.mubr.bf16.gmra.mxu0 %v375_v4  ;;  %v413_v4 = vpack.c.bf16 %v350_v0, %v343_v63  ;;  %v360_v22 = vpack.c.bf16 %v241_v18, %v234_v17  ;;  %v253_v25 = vld [vmem:[%s2107_s1 + $0xc8] sm:$0xff]  ;;  %v260_v12 = vld [vmem:[%s2107_s1 + $0x100] sm:$0xff]  ;;  %v267_v33 = vld [vmem:[%s2107_s1 + $0x138] sm:$0xff] }
  0x40   :  { %607 = vmatmul.mubr.bf16.gmra.mxu1 %v377_v6  ;;  %509 = vmatprep.mubr.bf16.mxu0 %v383_v7  ;;  %v347_v6 = vld [vmem:[%s2107_s1 + $0x3b8] sm:$0xff]  ;;  %v342_v7 = vld [vmem:[%s2107_s1 + $0x390] sm:$0xff]  ;;  %v261_v28 = vld [vmem:[%s2107_s1 + $0x108] sm:$0xff]  ;;  %v372_v38 = vpack.c.bf16 %v267_v33, %v260_v12 }
  0x41   :  { %614 = vmatprep.mubr.bf16.mxu1 %v385_v10  ;;  %1050 = vmatpush3.bf16.msra.mxu0 %v207_v11  ;;  %v240_v10 = vld [vmem:[%s2107_s1 + $0x60] sm:$0xff]  ;;  %v410_v11 = vpack.c.bf16 %v347_v6, %v340_v5  ;;  %v412_v13 = vpack.c.bf16 %v349_v8, %v342_v7  ;;  %v262_v34 = vld [vmem:[%s2107_s1 + $0x110] sm:$0xff]  ;;  %v269_v35 = vld [vmem:[%s2107_s1 + $0x148] sm:$0xff] }
  0x42   :  { %1051 = vmatprep.subr.bf16.mxu0 %v214_v16  ;;  %v359_v14 = vpack.c.bf16 %v240_v10, %v233_v9  ;;  %v239_v16 = vld [vmem:[%s2107_s1 + $0x58] sm:$0xff]  ;;  %v282_v37 = vld [vmem:[%s2107_s1 + $0x1b0] sm:$0xff]  ;;  %v374_v39 = vpack.c.bf16 %v269_v35, %v262_v34  ;;  %v289_v46 = vld [vmem:[%s2107_s1 + $0x1e8] sm:$0xff] }
  0x43   :  { %v358_v21 = vpack.c.bf16 %v239_v16, %v232_v15  ;;  %v275_v36 = vld [vmem:[%s2107_s1 + $0x178] sm:$0xff]  ;;  %v296_v47 = vld [vmem:[%s2107_s1 + $0x220] sm:$0xff]  ;;  %v302_v60 = vld [vmem:[%s2107_s1 + $0x250] sm:$0xff] }
  0x44   :  { %v283_v45 = vld [vmem:[%s2107_s1 + $0x1b8] sm:$0xff]  ;;  %v387_v50 = vpack.c.bf16 %v296_v47, %v289_v46  ;;  %v288_v51 = vld [vmem:[%s2107_s1 + $0x1e0] sm:$0xff]  ;;  %v309_v61 = vld [vmem:[%s2107_s1 + $0x288] sm:$0xff] }
  0x45   :  { %1052 = vmatpush3.bf16.msra.mxu0 %v206_v26  ;;  %v248_v26 = vld [vmem:[%s2107_s1 + $0xa0] sm:$0xff]  ;;  %v295_v52 = vld [vmem:[%s2107_s1 + $0x218] sm:$0xff]  ;;  %v317_v0 = vld [vmem:[%s2107_s1 + $0x2c8] sm:$0xff] }
  0x46   :  { %v386_v57 = vpack.c.bf16 %v295_v52, %v288_v51  ;;  %v304_v62 = vld [vmem:[%s2107_s1 + $0x260] sm:$0xff]  ;;  %v311_v63 = vld [vmem:[%s2107_s1 + $0x298] sm:$0xff]  ;;  %v318_v7 = vld [vmem:[%s2107_s1 + $0x2d0] sm:$0xff] }
  0x47   :  { %510 = vmatmul.mubr.bf16.gmra.mxu0 %v382_v29  ;;  %v268_v29 = vld [vmem:[%s2107_s1 + $0x140] sm:$0xff]  ;;  %v323_v6 = vld [vmem:[%s2107_s1 + $0x2f8] sm:$0xff]  ;;  %v325_v8 = vld [vmem:[%s2107_s1 + $0x308] sm:$0xff] }
  0x48   :  { %615 = vmatmul.mubr.bf16.gmra.mxu1 %v384_v30  ;;  %517 = vmatprep.mubr.bf16.mxu0 %v390_v31  ;;  %v365_v30 = vpack.c.bf16 %v253_v25, %v246_v24  ;;  %v367_v31 = vpack.c.bf16 %v255_v27, %v248_v26  ;;  %v316_v5 = vld [vmem:[%s2107_s1 + $0x2c0] sm:$0xff]  ;;  %v331_v9 = vld [vmem:[%s2107_s1 + $0x338] sm:$0xff]  ;;  %v338_v10 = vld [vmem:[%s2107_s1 + $0x370] sm:$0xff] }
  0x49   :  { %622 = vmatprep.mubr.bf16.mxu1 %v392_v32  ;;  %v373_v32 = vpack.c.bf16 %v268_v29, %v261_v28  ;;  %v330_v15 = vld [vmem:[%s2107_s1 + $0x330] sm:$0xff]  ;;  %v337_v16 = vld [vmem:[%s2107_s1 + $0x368] sm:$0xff]  ;;  %v332_v17 = vld [vmem:[%s2107_s1 + $0x340] sm:$0xff] }
  0x4a   :  { %v339_v18 = vld [vmem:[%s2107_s1 + $0x378] sm:$0xff]  ;;  %v345_v19 = vld [vmem:[%s2107_s1 + $0x3a8] sm:$0xff]  ;;  %v352_v20 = vld [vmem:[%s2107_s1 + $0x3e0] sm:$0xff] }
  0x4b   :  { %v344_v24 = vld [vmem:[%s2107_s1 + $0x3a0] sm:$0xff]  ;;  %v351_v25 = vld [vmem:[%s2107_s1 + $0x3d8] sm:$0xff]  ;;  %v346_v26 = vld [vmem:[%s2107_s1 + $0x3b0] sm:$0xff] }
  0x4c   :  { %v353_v27 = vld [vmem:[%s2107_s1 + $0x3e8] sm:$0xff]  ;;  %v414_v28 = vpack.c.bf16 %v351_v25, %v344_v24 }
  0x4d   :  { %v416_v29 = vpack.c.bf16 %v353_v27, %v346_v26 }
  0x4f   :  { %518 = vmatmul.mubr.bf16.gmra.mxu0 %v389_v40  ;;  %v380_v40 = vpack.c.bf16 %v282_v37, %v275_v36 }
  0x50   :  { %623 = vmatmul.mubr.bf16.gmra.mxu1 %v391_v41  ;;  %525 = vmatprep.mubr.bf16.mxu0 %v397_v42  ;;  %v274_v41 = vld [vmem:[%s2107_s1 + $0x170] sm:$0xff]  ;;  %v281_v42 = vld [vmem:[%s2107_s1 + $0x1a8] sm:$0xff] }
  0x51   :  { %630 = vmatprep.mubr.bf16.mxu1 %v399_v44  ;;  %v276_v44 = vld [vmem:[%s2107_s1 + $0x180] sm:$0xff]  ;;  %v379_v48 = vpack.c.bf16 %v281_v42, %v274_v41 }
  0x52   :  { %v381_v49 = vpack.c.bf16 %v283_v45, %v276_v44 }
  0x57   :  { %526 = vmatmul.mubr.bf16.gmra.mxu0 %v396_v53  ;;  %v290_v53 = vld [vmem:[%s2107_s1 + $0x1f0] sm:$0xff] }
  0x58   :  { %631 = vmatmul.mubr.bf16.gmra.mxu1 %v398_v54  ;;  %533 = vmatprep.mubr.bf16.mxu0 %v404_v55  ;;  %v297_v54 = vld [vmem:[%s2107_s1 + $0x228] sm:$0xff]  ;;  %v303_v55 = vld [vmem:[%s2107_s1 + $0x258] sm:$0xff] }
  0x59   :  { %638 = vmatprep.mubr.bf16.mxu1 %v406_v56  ;;  %v310_v56 = vld [vmem:[%s2107_s1 + $0x290] sm:$0xff]  ;;  %v388_v58 = vpack.c.bf16 %v297_v54, %v290_v53 }
  0x5a   :  { %v394_v59 = vpack.c.bf16 %v310_v56, %v303_v55 }
  0x5f   :  { %534 = vmatmul.mubr.bf16.gmra.mxu0 %v403_v1  ;;  %v324_v1 = vld [vmem:[%s2107_s1 + $0x300] sm:$0xff] }
  0x60   :  { %639 = vmatmul.mubr.bf16.gmra.mxu1 %v405_v2  ;;  %541 = vmatprep.mubr.bf16.mxu0 %v411_v3  ;;  %v393_v2 = vpack.c.bf16 %v309_v61, %v302_v60  ;;  %v395_v3 = vpack.c.bf16 %v311_v63, %v304_v62 }
  0x61   :  { %646 = vmatprep.mubr.bf16.mxu1 %v413_v4  ;;  %v401_v4 = vpack.c.bf16 %v324_v1, %v317_v0 }
  0x67   :  { %542 = vmatmul.mubr.bf16.gmra.mxu0 %v410_v11  ;;  %v400_v11 = vpack.c.bf16 %v323_v6, %v316_v5 }
  0x68   :  { %647 = vmatmul.mubr.bf16.gmra.mxu1 %v412_v13  ;;  %687 = vmatprep.mubr.bf16.mxu0 %v359_v14  ;;  %v402_v13 = vpack.c.bf16 %v325_v8, %v318_v7  ;;  %v408_v14 = vpack.c.bf16 %v338_v10, %v331_v9 }
  0x69   :  { %1134 = vmatprep.mubr.msk.bf16.mxu1 %vm1175_vm0, %v1174_v43 }
  0x6f   :  { %688 = vmatmul.mubr.bf16.vlgmr.msra.gmra.mxu0 %v358_v21  ;;  %v407_v21 = vpack.c.bf16 %v337_v16, %v330_v15 }
  0x70   :  { %1135 = vmatmul.mubr.msk.bf16.vlgmr.msra.gmra.mxu1 %vm417_vm1, %v360_v22  ;;  %695 = vmatprep.mubr.bf16.mxu0 %v366_v23  ;;  %v409_v22 = vpack.c.bf16 %v339_v18, %v332_v17  ;;  %v415_v23 = vpack.c.bf16 %v352_v20, %v345_v19 }
  0x71   :  { %1138 = vmatprep.mubr.msk.bf16.mxu1 %vm1175_vm0, %v1174_v43 }
  0x77   :  { %696 = vmatmul.mubr.bf16.gmra.mxu0 %v365_v30 }
  0x78   :  { %1139 = vmatmul.mubr.msk.bf16.gmra.mxu1 %vm417_vm1, %v367_v31  ;;  %703 = vmatprep.mubr.bf16.mxu0 %v373_v32 }
  0x79   :  { %1142 = vmatprep.mubr.msk.bf16.mxu1 %vm1175_vm0, %v1174_v43 }
  0x7f   :  { %704 = vmatmul.mubr.bf16.gmra.mxu0 %v372_v38 }
  0x80   :  { %1143 = vmatmul.mubr.msk.bf16.gmra.mxu1 %vm417_vm1, %v374_v39  ;;  %711 = vmatprep.mubr.bf16.mxu0 %v380_v40 }
  0x81   :  { %1146 = vmatprep.mubr.msk.bf16.mxu1 %vm1175_vm0, %v1174_v43 }
  0x87   :  { %712 = vmatmul.mubr.bf16.gmra.mxu0 %v379_v48 }
  0x88   :  { %1147 = vmatmul.mubr.msk.bf16.gmra.mxu1 %vm417_vm1, %v381_v49  ;;  %719 = vmatprep.mubr.bf16.mxu0 %v387_v50 }
  0x89   :  { %1150 = vmatprep.mubr.msk.bf16.mxu1 %vm1175_vm0, %v1174_v43 }
  0x8f   :  { %720 = vmatmul.mubr.bf16.gmra.mxu0 %v386_v57 }
  0x90   :  { %1151 = vmatmul.mubr.msk.bf16.gmra.mxu1 %vm417_vm1, %v388_v58  ;;  %727 = vmatprep.mubr.bf16.mxu0 %v394_v59 }
  0x91   :  { %1154 = vmatprep.mubr.msk.bf16.mxu1 %vm1175_vm0, %v1174_v43 }
  0x97   :  { %728 = vmatmul.mubr.bf16.gmra.mxu0 %v393_v2 }
  0x98   :  { %1155 = vmatmul.mubr.msk.bf16.gmra.mxu1 %vm417_vm1, %v395_v3  ;;  %735 = vmatprep.mubr.bf16.mxu0 %v401_v4 }
  0x99   :  { %1158 = vmatprep.mubr.msk.bf16.mxu1 %vm1175_vm0, %v1174_v43 }
  0x9f   :  { %736 = vmatmul.mubr.bf16.gmra.mxu0 %v400_v11 }
  0xa0   :  { %1159 = vmatmul.mubr.msk.bf16.gmra.mxu1 %vm417_vm1, %v402_v13  ;;  %743 = vmatprep.mubr.bf16.mxu0 %v408_v14 }
  0xa1   :  { %1162 = vmatprep.mubr.msk.bf16.mxu1 %vm1175_vm0, %v1174_v43 }
  0xa7   :  { %744 = vmatmul.mubr.bf16.gmra.mxu0 %v407_v21 }
  0xa8   :  { %1163 = vmatmul.mubr.msk.bf16.gmra.mxu1 %vm417_vm1, %v409_v22  ;;  %751 = vmatprep.mubr.bf16.mxu0 %v415_v23 }
  0xa9   :  { %1166 = vmatprep.mubr.msk.bf16.mxu1 %vm1175_vm0, %v1174_v43 }
  0xaf   :  { %752 = vmatmul.mubr.bf16.gmra.mxu0 %v414_v28 }
  0xb0   :  { %1167 = vmatmul.mubr.msk.bf16.gmra.mxu1 %vm417_vm1, %v416_v29 }
  0xe7   :  { %v913_v30 = vpop.f32.mrf.mxu0 }
  0xe8   :  { %v983_v31 = vpop.f32.mrf.mxu1 }
  0xe9   :  { %v914_v32 = vpop.f32.mrf.mxu0 }
  0xea   :  { %v915_v12 = vadd.f32 %v914_v32, %v913_v30  ;;  %v984_v33 = vpop.f32.mrf.mxu1 }
  0xeb   :  { %v985_v34 = vadd.f32 %v984_v33, %v983_v31  ;;  %v916_v43 = vpop.f32.mrf.mxu0 }
  0xec   :  { %v986_v35 = vpop.f32.mrf.mxu1 }
  0xed   :  { %v1980_v36 = vadd.f32 %v985_v34, %v915_v12  ;;  %v917_v37 = vpop.f32.mrf.mxu0 }
  0xee   :  { %v918_v38 = vadd.f32 %v917_v37, %v916_v43  ;;  %v987_v39 = vpop.f32.mrf.mxu1 }
  0xef   :  { %v988_v40 = vadd.f32 %v987_v39, %v986_v35  ;;  %v919_v41 = vpop.f32.mrf.mxu0 }
  0xf0   :  { %v989_v42 = vpop.f32.mrf.mxu1 }
  0xf1   :  { %v1982_v44 = vadd.f32 %v988_v40, %v918_v38  ;;  %v920_v45 = vpop.f32.mrf.mxu0 }
  0xf2   :  { %v921_v46 = vadd.f32 %v920_v45, %v919_v41  ;;  %v990_v47 = vpop.f32.mrf.mxu1 }
  0xf3   :  { %v991_v48 = vadd.f32 %v990_v47, %v989_v42  ;;  %v922_v49 = vpop.f32.mrf.mxu0 }
  0xf4   :  { %v992_v50 = vpop.f32.mrf.mxu1 }
  0xf5   :  { %v1984_v51 = vadd.f32 %v991_v48, %v921_v46  ;;  %v923_v52 = vpop.f32.mrf.mxu0 }
  0xf6   :  { %v924_v53 = vadd.f32 %v923_v52, %v922_v49  ;;  %v993_v54 = vpop.f32.mrf.mxu1 }
  0xf7   :  { %v994_v55 = vadd.f32 %v993_v54, %v992_v50  ;;  %v925_v56 = vpop.f32.mrf.mxu0 }
  0xf8   :  { %v995_v57 = vpop.f32.mrf.mxu1 }
  0xf9   :  { %v1986_v58 = vadd.f32 %v994_v55, %v924_v53  ;;  %v926_v59 = vpop.f32.mrf.mxu0 }
  0xfa   :  { %v927_v60 = vadd.f32 %v926_v59, %v925_v56  ;;  %v996_v61 = vpop.f32.mrf.mxu1 }
  0xfb   :  { %v997_v62 = vadd.f32 %v996_v61, %v995_v57  ;;  %v928_v63 = vpop.f32.mrf.mxu0 }
  0xfc   :  { %v998_v0 = vpop.f32.mrf.mxu1 }
  0xfd   :  { %v1988_v1 = vadd.f32 %v997_v62, %v927_v60  ;;  %v929_v2 = vpop.f32.mrf.mxu0 }
  0xfe   :  { %v930_v3 = vadd.f32 %v929_v2, %v928_v63  ;;  %v999_v4 = vpop.f32.mrf.mxu1 }
  0xff   :  { %v1000_v5 = vadd.f32 %v999_v4, %v998_v0  ;;  %v931_v6 = vpop.f32.mrf.mxu0 }
 0x100   :  { %v1001_v7 = vpop.f32.mrf.mxu1 }
 0x101   :  { %v1990_v8 = vadd.f32 %v1000_v5, %v930_v3  ;;  %v932_v9 = vpop.f32.mrf.mxu0 }
 0x102   :  { %v933_v10 = vadd.f32 %v932_v9, %v931_v6  ;;  %v1002_v11 = vpop.f32.mrf.mxu1 }
 0x103   :  { %v1003_v13 = vadd.f32 %v1002_v11, %v1001_v7  ;;  %v934_v14 = vpop.f32.mrf.mxu0 }
 0x104   :  { %v1004_v15 = vpop.f32.mrf.mxu1 }
 0x105   :  { %v1992_v16 = vadd.f32 %v1003_v13, %v933_v10  ;;  %v935_v17 = vpop.f32.mrf.mxu0 }
 0x106   :  { %v936_v18 = vadd.f32 %v935_v17, %v934_v14  ;;  %v1005_v19 = vpop.f32.mrf.mxu1 }
 0x107   :  { %v1006_v20 = vadd.f32 %v1005_v19, %v1004_v15  ;;  %v937_v21 = vpop.f32.mrf.mxu0 }
 0x108   :  { %v1007_v22 = vpop.f32.mrf.mxu1 }
 0x109   :  { %v1994_v23 = vadd.f32 %v1006_v20, %v936_v18  ;;  %v938_v24 = vpop.f32.mrf.mxu0 }
 0x10a   :  { %v939_v25 = vadd.f32 %v938_v24, %v937_v21  ;;  %v1008_v26 = vpop.f32.mrf.mxu1 }
 0x10b   :  { %v1009_v27 = vadd.f32 %v1008_v26, %v1007_v22  ;;  %v940_v28 = vpop.f32.mrf.mxu0 }
 0x10c   :  { %v1010_v29 = vpop.f32.mrf.mxu1 }
 0x10d   :  { %v1996_v30 = vadd.f32 %v1009_v27, %v939_v25  ;;  %v941_v31 = vpop.f32.mrf.mxu0 }
 0x10e   :  { %v942_v32 = vadd.f32 %v941_v31, %v940_v28  ;;  %v1011_v12 = vpop.f32.mrf.mxu1 }
 0x10f   :  { %v1012_v33 = vadd.f32 %v1011_v12, %v1010_v29  ;;  %v943_v34 = vpop.f32.mrf.mxu0 }
 0x110   :  { %v1013_v43 = vpop.f32.mrf.mxu1 }
 0x111   :  { %v1998_v35 = vadd.f32 %v1012_v33, %v942_v32  ;;  %v944_v37 = vpop.f32.mrf.mxu0 }
 0x112   :  { %v945_v38 = vadd.f32 %v944_v37, %v943_v34  ;;  %v1014_v39 = vpop.f32.mrf.mxu1 }
 0x113   :  { %v1015_v40 = vadd.f32 %v1014_v39, %v1013_v43  ;;  %v946_v41 = vpop.f32.mrf.mxu0 }
 0x114   :  { %v1016_v42 = vpop.f32.mrf.mxu1 }
 0x115   :  { %v2000_v45 = vadd.f32 %v1015_v40, %v945_v38  ;;  %v947_v46 = vpop.f32.mrf.mxu0 }
 0x116   :  { %v948_v47 = vadd.f32 %v947_v46, %v946_v41  ;;  %v1017_v48 = vpop.f32.mrf.mxu1 }
 0x117   :  { %v1018_v49 = vadd.f32 %v1017_v48, %v1016_v42  ;;  %v949_v50 = vpop.f32.mrf.mxu0 }
 0x118   :  { %v1019_v52 = vpop.f32.mrf.mxu1 }
 0x119   :  { %v2002_v53 = vadd.f32 %v1018_v49, %v948_v47  ;;  %v950_v54 = vpop.f32.mrf.mxu0 }
 0x11a   :  { %v951_v55 = vadd.f32 %v950_v54, %v949_v50  ;;  %v1020_v56 = vpop.f32.mrf.mxu1 }
 0x11b   :  { %v1021_v57 = vadd.f32 %v1020_v56, %v1019_v52  ;;  %v952_v59 = vpop.f32.mrf.mxu0 }
 0x11c   :  { %v1022_v60 = vpop.f32.mrf.mxu1 }
 0x11d   :  { %v2004_v61 = vadd.f32 %v1021_v57, %v951_v55  ;;  %v953_v62 = vpop.f32.mrf.mxu0 }
 0x11e   :  { %v954_v63 = vadd.f32 %v953_v62, %v952_v59  ;;  %v1023_v0 = vpop.f32.mrf.mxu1 }
 0x11f   :  { %v1024_v2 = vadd.f32 %v1023_v0, %v1022_v60  ;;  %v955_v3 = vpop.f32.mrf.mxu0 }
 0x120   :  { %v1025_v4 = vpop.f32.mrf.mxu1 }
 0x121   :  { %v2006_v5 = vadd.f32 %v1024_v2, %v954_v63  ;;  %v956_v6 = vpop.f32.mrf.mxu0 }
 0x122   :  { %v957_v7 = vadd.f32 %v956_v6, %v955_v3  ;;  %v1026_v9 = vpop.f32.mrf.mxu1 }
 0x123   :  { %v1027_v10 = vadd.f32 %v1026_v9, %v1025_v4  ;;  %v958_v11 = vpop.f32.mrf.mxu0 }
 0x124   :  { %v1028_v13 = vpop.f32.mrf.mxu1 }
 0x125   :  { %v2008_v14 = vadd.f32 %v1027_v10, %v957_v7  ;;  %v959_v15 = vpop.f32.mrf.mxu0 }
 0x126   :  { %v960_v17 = vadd.f32 %v959_v15, %v958_v11  ;;  %v1029_v18 = vpop.f32.mrf.mxu1 }
 0x127   :  { %v1030_v19 = vadd.f32 %v1029_v18, %v1028_v13  ;;  %v961_v20 = vpop.f32.mrf.mxu0 }
 0x128   :  { %v1031_v21 = vpop.f32.mrf.mxu1 }
 0x129   :  { %v2010_v22 = vadd.f32 %v1030_v19, %v960_v17  ;;  %v962_v24 = vpop.f32.mrf.mxu0 }
 0x12a   :  { %v963_v25 = vadd.f32 %v962_v24, %v961_v20  ;;  %v1032_v26 = vpop.f32.mrf.mxu1 }
 0x12b   :  { %v1033_v27 = vadd.f32 %v1032_v26, %v1031_v21  ;;  %v964_v28 = vpop.f32.mrf.mxu0 }
 0x12c   :  { %v1034_v29 = vpop.f32.mrf.mxu1 }
 0x12d   :  { %v2012_v31 = vadd.f32 %v1033_v27, %v963_v25  ;;  %v965_v32 = vpop.f32.mrf.mxu0 }
 0x12e   :  { %v966_v12 = vadd.f32 %v965_v32, %v964_v28  ;;  %v1035_v33 = vpop.f32.mrf.mxu1 }
 0x12f   :  { %v1036_v34 = vadd.f32 %v1035_v33, %v1034_v29  ;;  %v1053_v43 = vpop.f32.mrf.mxu0 }
 0x130   :  { %v794_v37 = vpop.f32.mrf.mxu1 }
 0x131   :  { %v2014_v38 = vadd.f32 %v1036_v34, %v966_v12  ;;  %v1054_v39 = vpop.f32.mrf.mxu0 }
 0x132   :  { %v1055_v40 = vadd.f32 %v1054_v39, %v1053_v43  ;;  %v1136_v41 = vpop.f32.mrf.mxu1 }
 0x133   :  { %v1056_v42 = vpop.f32.mrf.mxu0 }
 0x134   :  { %v690_v46 = vadd.f32 %v1055_v40, %v1980_v36  ;;  %v797_v47 = vpop.f32.mrf.mxu1 }
 0x135   :  { %v1057_v48 = vpop.f32.mrf.mxu0 }
 0x136   :  { %v795_v49 = vadd.f32 %v794_v37, %v690_v46  ;;  %v1058_v50 = vadd.f32 %v1057_v48, %v1056_v42  ;;  %v1137_v52 = vpop.f32.mrf.mxu1 }
 0x137   :  { %v1059_v54 = vpop.f32.mrf.mxu0 }
 0x138   :  { %866 = vst.msk [vmem:[%s2108_s2] sm:$0xff] %vm865_vm2, %v795_v49  ;;  %v693_v55 = vadd.f32 %v1058_v50, %v1982_v44  ;;  %v802_v56 = vpop.f32.mrf.mxu1 }
 0x139   :  { %v1060_v57 = vpop.f32.mrf.mxu0 }
 0x13a   :  { %v798_v59 = vadd.f32 %v797_v47, %v693_v55  ;;  %v1061_v60 = vadd.f32 %v1060_v57, %v1059_v54  ;;  %v1140_v62 = vpop.f32.mrf.mxu1 }
 0x13b   :  { %v1062_v36 = vpop.f32.mrf.mxu0 }
 0x13c   :  { %867 = vst.msk [vmem:[%s2108_s2 + $0x8] sm:$0xff] %vm865_vm2, %v798_v59  ;;  %v698_v63 = vadd.f32 %v1061_v60, %v1984_v51  ;;  %v805_v0 = vpop.f32.mrf.mxu1 }
 0x13d   :  { %v1063_v2 = vpop.f32.mrf.mxu0 }
 0x13e   :  { %v803_v3 = vadd.f32 %v802_v56, %v698_v63  ;;  %v1064_v4 = vadd.f32 %v1063_v2, %v1062_v36  ;;  %v1141_v6 = vpop.f32.mrf.mxu1 }
 0x13f   :  { %v1065_v7 = vpop.f32.mrf.mxu0 }
 0x140   :  { %868 = vst.msk [vmem:[%s2108_s2 + $0x10] sm:$0xff] %vm865_vm2, %v803_v3  ;;  %v701_v44 = vadd.f32 %v1064_v4, %v1986_v58  ;;  %v810_v9 = vpop.f32.mrf.mxu1 }
 0x141   :  { %v1066_v10 = vpop.f32.mrf.mxu0 }
 0x142   :  { %v806_v11 = vadd.f32 %v805_v0, %v701_v44  ;;  %v1067_v13 = vadd.f32 %v1066_v10, %v1065_v7  ;;  %v1144_v15 = vpop.f32.mrf.mxu1 }
 0x143   :  { %v1068_v17 = vpop.f32.mrf.mxu0 }
 0x144   :  { %869 = vst.msk [vmem:[%s2108_s2 + $0x18] sm:$0xff] %vm865_vm2, %v806_v11  ;;  %v706_v51 = vadd.f32 %v1067_v13, %v1988_v1  ;;  %v813_v18 = vpop.f32.mrf.mxu1 }
 0x145   :  { %v1069_v19 = vpop.f32.mrf.mxu0 }
 0x146   :  { %v811_v20 = vadd.f32 %v810_v9, %v706_v51  ;;  %v1070_v21 = vadd.f32 %v1069_v19, %v1068_v17  ;;  %v1145_v24 = vpop.f32.mrf.mxu1 }
 0x147   :  { %v1071_v25 = vpop.f32.mrf.mxu0 }
 0x148   :  { %870 = vst.msk [vmem:[%s2108_s2 + $0x20] sm:$0xff] %vm865_vm2, %v811_v20  ;;  %v709_v58 = vadd.f32 %v1070_v21, %v1990_v8  ;;  %v818_v26 = vpop.f32.mrf.mxu1 }
 0x149   :  { %v1072_v27 = vpop.f32.mrf.mxu0 }
 0x14a   :  { %v814_v28 = vadd.f32 %v813_v18, %v709_v58  ;;  %v1073_v29 = vadd.f32 %v1072_v27, %v1071_v25  ;;  %v1148_v32 = vpop.f32.mrf.mxu1 }
 0x14b   :  { %v1074_v12 = vpop.f32.mrf.mxu0 }
 0x14c   :  { %871 = vst.msk [vmem:[%s2108_s2 + $0x28] sm:$0xff] %vm865_vm2, %v814_v28  ;;  %v714_v1 = vadd.f32 %v1073_v29, %v1992_v16  ;;  %v821_v33 = vpop.f32.mrf.mxu1 }
 0x14d   :  { %v1075_v34 = vpop.f32.mrf.mxu0 }
 0x14e   :  { %v819_v43 = vadd.f32 %v818_v26, %v714_v1  ;;  %v1076_v37 = vadd.f32 %v1075_v34, %v1074_v12  ;;  %v1149_v39 = vpop.f32.mrf.mxu1 }
 0x14f   :  { %v1077_v40 = vpop.f32.mrf.mxu0 }
 0x150   :  { %872 = vst.msk [vmem:[%s2108_s2 + $0x30] sm:$0xff] %vm865_vm2, %v819_v43  ;;  %v717_v8 = vadd.f32 %v1076_v37, %v1994_v23  ;;  %v826_v41 = vpop.f32.mrf.mxu1 }
 0x151   :  { %v1078_v42 = vpop.f32.mrf.mxu0 }
 0x152   :  { %v822_v46 = vadd.f32 %v821_v33, %v717_v8  ;;  %v1079_v47 = vadd.f32 %v1078_v42, %v1077_v40  ;;  %v1152_v48 = vpop.f32.mrf.mxu1 }
 0x153   :  { %v1080_v49 = vpop.f32.mrf.mxu0 }
 0x154   :  { %873 = vst.msk [vmem:[%s2108_s2 + $0x38] sm:$0xff] %vm865_vm2, %v822_v46  ;;  %v722_v16 = vadd.f32 %v1079_v47, %v1996_v30  ;;  %v829_v50 = vpop.f32.mrf.mxu1 }
 0x155   :  { %v1081_v52 = vpop.f32.mrf.mxu0 }
 0x156   :  { %v827_v54 = vadd.f32 %v826_v41, %v722_v16  ;;  %v1082_v55 = vadd.f32 %v1081_v52, %v1080_v49  ;;  %v1153_v56 = vpop.f32.mrf.mxu1 }
 0x157   :  { %v1083_v57 = vpop.f32.mrf.mxu0 }
 0x158   :  { %874 = vst.msk [vmem:[%s2108_s2 + $0x40] sm:$0xff] %vm865_vm2, %v827_v54  ;;  %v725_v23 = vadd.f32 %v1082_v55, %v1998_v35  ;;  %v834_v59 = vpop.f32.mrf.mxu1 }
 0x159   :  { %v1084_v60 = vpop.f32.mrf.mxu0 }
 0x15a   :  { %v830_v62 = vadd.f32 %v829_v50, %v725_v23  ;;  %v1085_v36 = vadd.f32 %v1084_v60, %v1083_v57  ;;  %v1156_v63 = vpop.f32.mrf.mxu1 }
 0x15b   :  { %v1086_v0 = vpop.f32.mrf.mxu0 }
 0x15c   :  { %875 = vst.msk [vmem:[%s2108_s2 + $0x48] sm:$0xff] %vm865_vm2, %v830_v62  ;;  %v730_v30 = vadd.f32 %v1085_v36, %v2000_v45  ;;  %v837_v2 = vpop.f32.mrf.mxu1 }
 0x15d   :  { %v1087_v3 = vpop.f32.mrf.mxu0 }
 0x15e   :  { %v835_v4 = vadd.f32 %v834_v59, %v730_v30  ;;  %v1088_v6 = vadd.f32 %v1087_v3, %v1086_v0  ;;  %v1157_v7 = vpop.f32.mrf.mxu1 }
 0x15f   :  { %v1089_v44 = vpop.f32.mrf.mxu0 }
 0x160   :  { %876 = vst.msk [vmem:[%s2108_s2 + $0x50] sm:$0xff] %vm865_vm2, %v835_v4  ;;  %v733_v35 = vadd.f32 %v1088_v6, %v2002_v53  ;;  %v842_v9 = vpop.f32.mrf.mxu1 }
 0x161   :  { %v1090_v10 = vpop.f32.mrf.mxu0 }
 0x162   :  { %v838_v11 = vadd.f32 %v837_v2, %v733_v35  ;;  %v1091_v13 = vadd.f32 %v1090_v10, %v1089_v44  ;;  %v1160_v15 = vpop.f32.mrf.mxu1 }
 0x163   :  { %v1092_v17 = vpop.f32.mrf.mxu0 }
 0x164   :  { %877 = vst.msk [vmem:[%s2108_s2 + $0x58] sm:$0xff] %vm865_vm2, %v838_v11  ;;  %v738_v45 = vadd.f32 %v1091_v13, %v2004_v61  ;;  %v845_v51 = vpop.f32.mrf.mxu1 }
 0x165   :  { %v1093_v18 = vpop.f32.mrf.mxu0 }
 0x166   :  { %v843_v19 = vadd.f32 %v842_v9, %v738_v45  ;;  %v1094_v20 = vadd.f32 %v1093_v18, %v1092_v17  ;;  %v1161_v21 = vpop.f32.mrf.mxu1 }
 0x167   :  { %v1095_v24 = vpop.f32.mrf.mxu0 }
 0x168   :  { %878 = vst.msk [vmem:[%s2108_s2 + $0x60] sm:$0xff] %vm865_vm2, %v843_v19  ;;  %v741_v53 = vadd.f32 %v1094_v20, %v2006_v5  ;;  %v850_v25 = vpop.f32.mrf.mxu1 }
 0x169   :  { %v1096_v58 = vpop.f32.mrf.mxu0 }
 0x16a   :  { %v846_v26 = vadd.f32 %v845_v51, %v741_v53  ;;  %v1097_v27 = vadd.f32 %v1096_v58, %v1095_v24  ;;  %v1164_v28 = vpop.f32.mrf.mxu1 }
 0x16b   :  { %v1098_v29 = vpop.f32.mrf.mxu0 }
 0x16c   :  { %879 = vst.msk [vmem:[%s2108_s2 + $0x68] sm:$0xff] %vm865_vm2, %v846_v26  ;;  %v746_v61 = vadd.f32 %v1097_v27, %v2008_v14  ;;  %v853_v32 = vpop.f32.mrf.mxu1 }
 0x16d   :  { %v1099_v12 = vpop.f32.mrf.mxu0 }
 0x16e   :  { %v851_v1 = vadd.f32 %v850_v25, %v746_v61  ;;  %v1100_v33 = vadd.f32 %v1099_v12, %v1098_v29  ;;  %v1165_v34 = vpop.f32.mrf.mxu1 }
 0x16f   :  { %v1101_v43 = vpop.f32.mrf.mxu0 }
 0x170   :  { %880 = vst.msk [vmem:[%s2108_s2 + $0x70] sm:$0xff] %vm865_vm2, %v851_v1  ;;  %v749_v5 = vadd.f32 %v1100_v33, %v2010_v22  ;;  %v858_v37 = vpop.f32.mrf.mxu1 }
 0x171   :  { %v1102_v39 = vpop.f32.mrf.mxu0 }
 0x172   :  { %v854_v40 = vadd.f32 %v853_v32, %v749_v5  ;;  %v1103_v8 = vadd.f32 %v1102_v39, %v1101_v43  ;;  %v1168_v41 = vpop.f32.mrf.mxu1 }
 0x173   :  { %v1104_v42 = vpop.f32.mrf.mxu0 }
 0x174   :  { %881 = vst.msk [vmem:[%s2108_s2 + $0x78] sm:$0xff] %vm865_vm2, %v854_v40  ;;  %v754_v14 = vadd.f32 %v1103_v8, %v2012_v31  ;;  %v861_v46 = vpop.f32.mrf.mxu1 }
 0x175   :  { %v1105_v47 = vpop.f32.mrf.mxu0 }
 0x176   :  { %v859_v48 = vadd.f32 %v858_v37, %v754_v14  ;;  %v1106_v49 = vadd.f32 %v1105_v47, %v1104_v42  ;;  %v1169_v16 = vpop.f32.mrf.mxu1 }
 0x178   :  { %882 = vst.msk [vmem:[%s2108_s2 + $0x80] sm:$0xff] %vm865_vm2, %v859_v48  ;;  %v757_v22 = vadd.f32 %v1106_v49, %v2014_v38 }
 0x17a   :  { %v862_v50 = vadd.f32 %v861_v46, %v757_v22 }
 0x17c   :  { %883 = vst.msk [vmem:[%s2108_s2 + $0x88] sm:$0xff] %vm865_vm2, %v862_v50 }

</bundles_post_ra>
